<compile_context>
chip_gen: v5e
topology: v5e:2x2
jax: 0.10.0
libtpu: 0.0.40
codegen_flags: <defaults>
</compile_context>

<pallas_src>
import functools

import numpy as np
import jax
import jax.numpy as jnp
from jax.experimental import pallas as pl
from jax.experimental.pallas import tpu as pltpu


# ----------------------------- interpolation helpers -------------------------

def _interp_matrix(in_size: int, sf: int) -> jnp.ndarray:
    """(out, in) linear-interp matrix, PyTorch trilinear, align_corners=False."""
    out_size = in_size * sf
    m = np.zeros((out_size, in_size), np.float32)
    for o in range(out_size):
        src = (o + 0.5) / sf - 0.5
        src = max(src, 0.0)
        lo = min(int(np.floor(src)), in_size - 1)
        hi = min(lo + 1, in_size - 1)
        frac = src - lo
        m[o, lo] += 1.0 - frac
        m[o, hi] += frac
    return jnp.asarray(m)


def _d_taps(sf: int):
    """Per output phase r in [0, sf): (input offset, frac) of the 2-tap interp."""
    taps = []
    for r in range(sf):
        sfrac = (r + 0.5) / sf - 0.5
        if sfrac < 0.0:
            taps.append((-1, float(sfrac + 1.0)))
        else:
            taps.append((0, float(sfrac)))
    return tuple(taps)


# --------------------------------- kernel ------------------------------------

def _dsv_kernel(x_ref, w_ref, b_ref, wh_ref, ww_ref, o_ref, *, cin, sf, taps):
    # x_ref : (Cin, D, H, W)  VMEM   one batch sample
    # w_ref : (Cout, Cin)     SMEM   1x1x1 conv weight
    # b_ref : (Cout,)         SMEM   conv bias
    # wh_ref: (Ho, H)         VMEM   H interpolation matrix
    # ww_ref: (Wo, W)         VMEM   W interpolation matrix
    # o_ref : (Do, Ho, Wo)    VMEM   output volume for this (n, co)
    co = pl.program_id(1)
    d_in = x_ref.shape[1]
    h_in = x_ref.shape[2]
    w_in = x_ref.shape[3]
    h_out = wh_ref.shape[0]
    w_out = ww_ref.shape[0]

    # ---- 1x1x1 conv for this output channel: VPU scalar FMAs over Cin ------
    y = x_ref[0] * w_ref[co, 0]
    for ci in range(1, cin):
        y = y + x_ref[ci] * w_ref[co, ci]
    y = y + b_ref[co]                                          # (D, H, W) f32

    # ---- H interpolation: batched matmul over the D axis (MXU, in-VMEM) ----
    wh_b = jnp.broadcast_to(wh_ref[...], (d_in, h_out, h_in))
    yh = jnp.einsum("dih,dhw->diw", wh_b, y,
                    preferred_element_type=jnp.float32)        # (D, Ho, W)

    # ---- W interpolation: batched matmul, contract last dims ---------------
    ww_b = jnp.broadcast_to(ww_ref[...], (d_in, w_out, w_in))
    yw = jnp.einsum("diw,dow->dio", yh, ww_b,
                    preferred_element_type=jnp.float32)        # (D, Ho, Wo)

    # ---- D interpolation: 2-tap VPU stencil along the leading axis ---------
    if sf == 1:
        out = yw
    else:
        y_0 = yw
        if d_in > 1:
            y_m1 = jnp.concatenate([yw[:1], yw[:-1]], axis=0)  # clamp shift -1
            y_p1 = jnp.concatenate([yw[1:], yw[-1:]], axis=0)  # clamp shift +1
        else:
            y_m1 = yw
            y_p1 = yw
        phases = []
        for off, frac in taps:
            lo, hi = (y_m1, y_0) if off == -1 else (y_0, y_p1)
            phases.append((1.0 - frac) * lo + frac * hi)       # (D, Ho, Wo)
        out = jnp.stack(phases, axis=1).reshape(d_in * sf, h_out, w_out)

    o_ref[...] = out.astype(o_ref.dtype)


# --------------------------------- wrapper -----------------------------------

def unet_dsv3d(x, weight, bias, scale_factor):
    """Forward pass of UnetDsv3D.

    x      : (N, Cin, D, H, W) float32 (NCDHW, as in PyTorch)
    weight : (Cout, Cin)       float32 (conv weight with 1x1x1 kernel squeezed)
    bias   : (Cout,)           float32
    returns: (N, Cout, D*sf, H*sf, W*sf) float32
    """
    # TODO(synk): only integer scale factors are supported; non-integer scales
    # would need a different (non-phase-periodic) D decomposition.
    sf = int(scale_factor)
    assert sf == scale_factor and sf >= 1
    n, cin, d, h, w = x.shape
    cout = weight.shape[0]
    do, ho, wo = d * sf, h * sf, w * sf

    wh = _interp_matrix(h, sf)        # (Ho, H)
    ww = _interp_matrix(w, sf)        # (Wo, W)
    taps = _d_taps(sf)

    kernel = functools.partial(_dsv_kernel, cin=cin, sf=sf, taps=taps)

    flops = (2 * n * cout * cin * d * h * w          # conv
             + 2 * n * cout * d * ho * h * w         # H interp
             + 2 * n * cout * d * ho * w * wo        # W interp
             + 3 * n * cout * do * ho * wo)          # D stencil
    bytes_accessed = 4 * (x.size + n * cout * do * ho * wo
                          + weight.size + bias.size + wh.size + ww.size)

    return pl.pallas_call(
        kernel,
        out_shape=jax.ShapeDtypeStruct((n, cout, do, ho, wo), x.dtype),
        grid=(n, cout),
        in_specs=[
            pl.BlockSpec((None, cin, d, h, w), lambda i, j: (i, 0, 0, 0, 0)),
            pl.BlockSpec(memory_space=pltpu.MemorySpace.SMEM),   # weight
            pl.BlockSpec(memory_space=pltpu.MemorySpace.SMEM),   # bias
            pl.BlockSpec((ho, h), lambda i, j: (0, 0)),          # Wh
            pl.BlockSpec((wo, w), lambda i, j: (0, 0)),          # Ww
        ],
        out_specs=pl.BlockSpec((None, None, do, ho, wo),
                               lambda i, j: (i, j, 0, 0, 0)),
        compiler_params=pltpu.CompilerParams(
            dimension_semantics=("parallel", "parallel"),
            vmem_limit_bytes=32 * 1024 * 1024,
        ),
        cost_estimate=pl.CostEstimate(
            flops=flops, transcendentals=0, bytes_accessed=bytes_accessed),
    )(x, weight, bias, wh, ww)


# ------------------------------ reference (JAX) -------------------------------

def _reference(x, weight, bias, scale_factor):
    sf = int(scale_factor)
    _, _, d, h, w = x.shape
    y = jnp.einsum("ncdhw,oc->nodhw", x, weight) + bias[None, :, None, None, None]
    wd = _interp_matrix(d, sf)
    wh = _interp_matrix(h, sf)
    ww = _interp_matrix(w, sf)
    y = jnp.einsum("ncdhw,Dd->ncDhw", y, wd)
    y = jnp.einsum("ncdhw,Hh->ncdHw", y, wh)
    y = jnp.einsum("ncdhw,Ww->ncdhW", y, ww)
    return y


# ---------------------------------- main --------------------------------------

if __name__ == "__main__":
    key = jax.random.PRNGKey(0)
    k_x, k_w, k_b = jax.random.split(key, 3)

    N, Cin, Cout = 2, 4, 2
    D, H, W = 4, 8, 8
    scale_factor = 2

    x = jax.random.normal(k_x, (N, Cin, D, H, W), dtype=jnp.float32)
    # PyTorch conv weight (Cout, Cin, 1, 1, 1) squeezed to (Cout, Cin).
    weight = 0.1 * jax.random.normal(k_w, (Cout, Cin), dtype=jnp.float32)
    bias = 0.05 * jax.random.normal(k_b, (Cout,), dtype=jnp.float32)

    fwd = jax.jit(functools.partial(unet_dsv3d, scale_factor=scale_factor))
    out = jax.block_until_ready(fwd(x, weight, bias))

    ref = _reference(x, weight, bias, scale_factor)
    assert out.shape == (N, Cout, D * scale_factor, H * scale_factor, W * scale_factor)
    assert jnp.allclose(out, ref, atol=1e-5, rtol=1e-5), "mismatch vs reference"

    print("KERNEL_OK")
</pallas_src>

<mosaic_0001>
module attributes {stable_mosaic.version = 11 : i64} {
  func.func @_dsv_kernel(%arg0: i32, %arg1: i32, %arg2: memref<1x4x4x8x8xf32, #tpu.memory_space<vmem>>, %arg3: memref<2x4xf32, #tpu.memory_space<smem>>, %arg4: memref<2xf32, #tpu.memory_space<smem>>, %arg5: memref<16x8xf32, #tpu.memory_space<vmem>>, %arg6: memref<16x8xf32, #tpu.memory_space<vmem>>, %arg7: memref<1x1x8x16x16xf32, #tpu.memory_space<vmem>>) attributes {dimension_semantics = [#tpu.dimension_semantics<parallel>, #tpu.dimension_semantics<parallel>], iteration_bounds = array<i64: 2, 2>, scalar_prefetch = 0 : i64, scratch_operands = 0 : i64, tpu.core_type = #tpu.core_type<tc>, window_params = [{transform_indices = @transform_0, window_bounds = array<i64: 1, 4, 4, 8, 8>}, {transform_indices = @transform_1, window_bounds = array<i64: 2, 4>}, {transform_indices = @transform_2, window_bounds = array<i64: 2>}, {pipeline_mode = #tpu.pipeline_mode<synchronous>, transform_indices = @transform_3, window_bounds = array<i64: 16, 8>}, {pipeline_mode = #tpu.pipeline_mode<synchronous>, transform_indices = @transform_4, window_bounds = array<i64: 16, 8>}, {transform_indices = @transform_5, window_bounds = array<i64: 1, 1, 8, 16, 16>}]} {
    %c0 = arith.constant 0 : index
    %c0_0 = arith.constant 0 : index
    %c0_1 = arith.constant 0 : index
    %c0_2 = arith.constant 0 : index
    %c0_3 = arith.constant 0 : index
    %0 = vector.load %arg2[%c0, %c0_0, %c0_1, %c0_2, %c0_3] : memref<1x4x4x8x8xf32, #tpu.memory_space<vmem>>, vector<1x1x4x8x8xf32>
    %1 = vector.shape_cast %0 : vector<1x1x4x8x8xf32> to vector<4x8x8xf32>
    %2 = arith.index_cast %arg1 : i32 to index
    %c0_4 = arith.constant 0 : index
    %3 = memref.load %arg3[%2, %c0_4] : memref<2x4xf32, #tpu.memory_space<smem>>
    %4 = vector.broadcast %3 : f32 to vector<4x8x8xf32>
    %5 = arith.mulf %1, %4 : vector<4x8x8xf32>
    %c0_5 = arith.constant 0 : index
    %c1 = arith.constant 1 : index
    %c0_6 = arith.constant 0 : index
    %c0_7 = arith.constant 0 : index
    %c0_8 = arith.constant 0 : index
    %6 = vector.load %arg2[%c0_5, %c1, %c0_6, %c0_7, %c0_8] : memref<1x4x4x8x8xf32, #tpu.memory_space<vmem>>, vector<1x1x4x8x8xf32>
    %7 = vector.shape_cast %6 : vector<1x1x4x8x8xf32> to vector<4x8x8xf32>
    %8 = arith.index_cast %arg1 : i32 to index
    %c1_9 = arith.constant 1 : index
    %9 = memref.load %arg3[%8, %c1_9] : memref<2x4xf32, #tpu.memory_space<smem>>
    %10 = vector.broadcast %9 : f32 to vector<4x8x8xf32>
    %11 = arith.mulf %7, %10 : vector<4x8x8xf32>
    %12 = arith.addf %5, %11 : vector<4x8x8xf32>
    %c0_10 = arith.constant 0 : index
    %c2 = arith.constant 2 : index
    %c0_11 = arith.constant 0 : index
    %c0_12 = arith.constant 0 : index
    %c0_13 = arith.constant 0 : index
    %13 = vector.load %arg2[%c0_10, %c2, %c0_11, %c0_12, %c0_13] : memref<1x4x4x8x8xf32, #tpu.memory_space<vmem>>, vector<1x1x4x8x8xf32>
    %14 = vector.shape_cast %13 : vector<1x1x4x8x8xf32> to vector<4x8x8xf32>
    %15 = arith.index_cast %arg1 : i32 to index
    %c2_14 = arith.constant 2 : index
    %16 = memref.load %arg3[%15, %c2_14] : memref<2x4xf32, #tpu.memory_space<smem>>
    %17 = vector.broadcast %16 : f32 to vector<4x8x8xf32>
    %18 = arith.mulf %14, %17 : vector<4x8x8xf32>
    %19 = arith.addf %12, %18 : vector<4x8x8xf32>
    %c0_15 = arith.constant 0 : index
    %c3 = arith.constant 3 : index
    %c0_16 = arith.constant 0 : index
    %c0_17 = arith.constant 0 : index
    %c0_18 = arith.constant 0 : index
    %20 = vector.load %arg2[%c0_15, %c3, %c0_16, %c0_17, %c0_18] : memref<1x4x4x8x8xf32, #tpu.memory_space<vmem>>, vector<1x1x4x8x8xf32>
    %21 = vector.shape_cast %20 : vector<1x1x4x8x8xf32> to vector<4x8x8xf32>
    %22 = arith.index_cast %arg1 : i32 to index
    %c3_19 = arith.constant 3 : index
    %23 = memref.load %arg3[%22, %c3_19] : memref<2x4xf32, #tpu.memory_space<smem>>
    %24 = vector.broadcast %23 : f32 to vector<4x8x8xf32>
    %25 = arith.mulf %21, %24 : vector<4x8x8xf32>
    %26 = arith.addf %19, %25 : vector<4x8x8xf32>
    %27 = arith.index_cast %arg1 : i32 to index
    %28 = memref.load %arg4[%27] : memref<2xf32, #tpu.memory_space<smem>>
    %29 = vector.broadcast %28 : f32 to vector<4x8x8xf32>
    %30 = arith.addf %26, %29 : vector<4x8x8xf32>
    %c0_20 = arith.constant 0 : index
    %c0_21 = arith.constant 0 : index
    %31 = vector.load %arg5[%c0_20, %c0_21] : memref<16x8xf32, #tpu.memory_space<vmem>>, vector<16x8xf32>
    %32 = vector.shape_cast %31 : vector<16x8xf32> to vector<1x16x8xf32>
    %33 = vector.broadcast %32 : vector<1x16x8xf32> to vector<4x16x8xf32>
    "tpu.trace_start"() <{level = 10 : i32, message = "dih,dhw->diw"}> : () -> ()
    %cst = arith.constant dense<0.000000e+00> : vector<4x16x8xf32>
    %34 = tpu.matmul %33, %30, %cst {dimension_numbers = #tpu.dot_dimension_numbers<[2], [1], [1], [2], [0, 0, 0, 1, 1, 2], [0], [0]>} : vector<4x16x8xf32>, vector<4x8x8xf32>, vector<4x16x8xf32> -> vector<4x16x8xf32>
    "tpu.trace_stop"() : () -> ()
    %c0_22 = arith.constant 0 : index
    %c0_23 = arith.constant 0 : index
    %35 = vector.load %arg6[%c0_22, %c0_23] : memref<16x8xf32, #tpu.memory_space<vmem>>, vector<16x8xf32>
    %36 = vector.shape_cast %35 : vector<16x8xf32> to vector<1x16x8xf32>
    %37 = vector.broadcast %36 : vector<1x16x8xf32> to vector<4x16x8xf32>
    "tpu.trace_start"() <{level = 10 : i32, message = "diw,dow->dio"}> : () -> ()
    %cst_24 = arith.constant dense<0.000000e+00> : vector<4x16x16xf32>
    %38 = tpu.matmul %34, %37, %cst_24 {dimension_numbers = #tpu.dot_dimension_numbers<[2], [2], [1], [1], [0, 0, 0, 1, 1, 1], [0], [0]>} : vector<4x16x8xf32>, vector<4x16x8xf32>, vector<4x16x16xf32> -> vector<4x16x16xf32>
    "tpu.trace_stop"() : () -> ()
    %39 = vector.extract_strided_slice %38 {offsets = [0, 0, 0], sizes = [1, 16, 16], strides = [1, 1, 1]} : vector<4x16x16xf32> to vector<1x16x16xf32>
    %40 = vector.extract_strided_slice %38 {offsets = [0, 0, 0], sizes = [3, 16, 16], strides = [1, 1, 1]} : vector<4x16x16xf32> to vector<3x16x16xf32>
    %41 = tpu.concatenate %39, %40 in 0 : vector<1x16x16xf32>, vector<3x16x16xf32> -> vector<4x16x16xf32>
    %42 = vector.extract_strided_slice %38 {offsets = [1, 0, 0], sizes = [3, 16, 16], strides = [1, 1, 1]} : vector<4x16x16xf32> to vector<3x16x16xf32>
    %43 = vector.extract_strided_slice %38 {offsets = [3, 0, 0], sizes = [1, 16, 16], strides = [1, 1, 1]} : vector<4x16x16xf32> to vector<1x16x16xf32>
    %44 = tpu.concatenate %42, %43 in 0 : vector<3x16x16xf32>, vector<1x16x16xf32> -> vector<4x16x16xf32>
    %cst_25 = arith.constant 2.500000e-01 : f32
    %45 = vector.broadcast %cst_25 : f32 to vector<4x16x16xf32>
    %46 = arith.mulf %45, %41 : vector<4x16x16xf32>
    %cst_26 = arith.constant 7.500000e-01 : f32
    %47 = vector.broadcast %cst_26 : f32 to vector<4x16x16xf32>
    %48 = arith.mulf %47, %38 : vector<4x16x16xf32>
    %49 = arith.addf %46, %48 : vector<4x16x16xf32>
    %cst_27 = arith.constant 7.500000e-01 : f32
    %50 = vector.broadcast %cst_27 : f32 to vector<4x16x16xf32>
    %51 = arith.mulf %50, %38 : vector<4x16x16xf32>
    %cst_28 = arith.constant 2.500000e-01 : f32
    %52 = vector.broadcast %cst_28 : f32 to vector<4x16x16xf32>
    %53 = arith.mulf %52, %44 : vector<4x16x16xf32>
    %54 = arith.addf %51, %53 : vector<4x16x16xf32>
    %55 = vector.shape_cast %49 : vector<4x16x16xf32> to vector<4x1x16x16xf32>
    %56 = vector.shape_cast %54 : vector<4x16x16xf32> to vector<4x1x16x16xf32>
    %57 = tpu.concatenate %55, %56 in 1 : vector<4x1x16x16xf32>, vector<4x1x16x16xf32> -> vector<4x2x16x16xf32>
    %58 = vector.shape_cast %57 : vector<4x2x16x16xf32> to vector<8x16x16xf32>
    %c0_29 = arith.constant 0 : index
    %c0_30 = arith.constant 0 : index
    %c0_31 = arith.constant 0 : index
    %c0_32 = arith.constant 0 : index
    %c0_33 = arith.constant 0 : index
    %59 = vector.load %arg7[%c0_29, %c0_30, %c0_31, %c0_32, %c0_33] : memref<1x1x8x16x16xf32, #tpu.memory_space<vmem>>, vector<1x1x8x16x16xf32>
    %60 = vector.shape_cast %59 : vector<1x1x8x16x16xf32> to vector<8x16x16xf32>
    %61 = vector.shape_cast %58 : vector<8x16x16xf32> to vector<1x1x8x16x16xf32>
    tpu.vector_store %arg7[%c0_29, %c0_30, %c0_31, %c0_32, %c0_33], %61 {strides = array<i32>} : memref<1x1x8x16x16xf32, #tpu.memory_space<vmem>>, vector<1x1x8x16x16xf32>,
    return
  }
  func.func @transform_0(%arg0: i32, %arg1: i32) -> (i32, i32, i32, i32, i32) {
    %c0_i32 = arith.constant 0 : i32
    %c0_i32_0 = arith.constant 0 : i32
    %c0_i32_1 = arith.constant 0 : i32
    %c0_i32_2 = arith.constant 0 : i32
    %c0_i32_3 = arith.constant 0 : i32
    return %arg0, %c0_i32, %c0_i32_0, %c0_i32_1, %c0_i32_2 : i32, i32, i32, i32, i32
  }
  func.func @transform_1(%arg0: i32, %arg1: i32) -> (i32, i32) {
    %c0_i32 = arith.constant 0 : i32
    %c0_i32_0 = arith.constant 0 : i32
    %c0_i32_1 = arith.constant 0 : i32
    return %c0_i32, %c0_i32_0 : i32, i32
  }
  func.func @transform_2(%arg0: i32, %arg1: i32) -> i32 {
    %c0_i32 = arith.constant 0 : i32
    %c0_i32_0 = arith.constant 0 : i32
    return %c0_i32 : i32
  }
  func.func @transform_3(%arg0: i32, %arg1: i32) -> (i32, i32) {
    %c0_i32 = arith.constant 0 : i32
    %c0_i32_0 = arith.constant 0 : i32
    %c0_i32_1 = arith.constant 0 : i32
    return %c0_i32, %c0_i32_0 : i32, i32
  }
  func.func @transform_4(%arg0: i32, %arg1: i32) -> (i32, i32) {
    %c0_i32 = arith.constant 0 : i32
    %c0_i32_0 = arith.constant 0 : i32
    %c0_i32_1 = arith.constant 0 : i32
    return %c0_i32, %c0_i32_0 : i32, i32
  }
  func.func @transform_5(%arg0: i32, %arg1: i32) -> (i32, i32, i32, i32, i32) {
    %c0_i32 = arith.constant 0 : i32
    %c0_i32_0 = arith.constant 0 : i32
    %c0_i32_1 = arith.constant 0 : i32
    %c0_i32_2 = arith.constant 0 : i32
    return %arg0, %arg1, %c0_i32, %c0_i32_0, %c0_i32_1 : i32, i32, i32, i32, i32
  }
}

</mosaic_0001>

<bundles_post_ra>
// kernel: unet_dsv3d.1
= control target key start
LH: loop header
LB: loop body
LE: loop exit
PB: predicated region body
PF: predicated region fallthrough
CT: control target
= control target key end

     0   :  { %s1624_s0 = inlined_call_operand.hbm [shape: f32[2,4,4,8,8], index: 0, kind: input, shape index: {}]   ;;  %s1625_s1 = inlined_call_operand.hbm [shape: f32[2,4], index: 1, kind: input, shape index: {}]   ;;  %s1626_s2 = inlined_call_operand.vmem [shape: f32[2], index: 2, kind: input, shape index: {}]   ;;  %s1627_s3 = inlined_call_operand.hbm [shape: f32[16,8], index: 3, kind: input, shape index: {}, may-alias: {3,4}]   ;;  %s1628_s4 = inlined_call_operand.hbm [shape: f32[16,8], index: 4, kind: input, shape index: {}, may-alias: {3,4}]   ;;  %s1629_s5 = inlined_call_operand.hbm [shape: f32[2,2,8,16,16], index: 5, kind: output, shape index: {}]  }
   0x1   :  { %1639 = sst [smem:[#allocation24_spill]] %s1625_s1 }
   0x2   :  { %1640 = sst [smem:[#allocation25_spill]] %s1626_s2 }
   0x3   :  { %1641 = sst [smem:[#allocation26_spill]] %s1627_s3 }
   0x4   :  { %1642 = sst [smem:[#allocation27_spill]] %s1628_s4 }
   0x5   :  { %10 = vsyncpa [#allocation3], 0 }
   0x6   :  { %12 = vsyncpa [#allocation3 + $0x1], 0 }
   0x7   :  { %13 = vsyncpa [#allocation5], 0 }
   0x8   :  { %14 = vsyncpa [#allocation6], 0 }
   0x9   :  { %15 = vsyncpa [#allocation10], 0 }
   0xa   :  { %16 = vsyncpa [#allocation4], 0 }
   0xb   :  { %18 = vsyncpa [#allocation4 + $0x1], 0  ;;  %s1309_s18 = smov 0   ;;  %s1311_s19 = smov 0  }
   0xc   :  { %s1313_s20 = smov 0   ;;  %s1315_s21 = smov 0  }
   0xd   :  { %s1317_s22 = smov 0   ;;  %s1319_s23 = smov 0  }
   0xe   :  { %s1321_s24 = smov 0   ;;  %s1323_s25 = smov 0  }
   0xf   :  { %s1325_s26 = smov 0   ;;  %s1327_s27 = smov 0  }
  0x10   :  { %s1329_s28 = smov 0  }
  0x11 LB: > { %1643 = sst [smem:[#allocation18_spill]] %s1229_s18  ;;  %s806_s29 = sadd.s32 4294967295, %s1269_s28   ;;  %s1269_s28 = sphi %s1329_s28, %s24_s28   ;;  %s1265_s27 = sphi %s1327_s27, %s1677_s27   ;;  %s1261_s26 = sphi %s1325_s26, %s1667_s26   ;;  %s1257_s25 = sphi %s1323_s25, %s1676_s25   ;;  %s1253_s24 = sphi %s1321_s24, %s1675_s24   ;;  %s1249_s23 = sphi %s1319_s23, %s1674_s23   ;;  %s1245_s22 = sphi %s1317_s22, %s1673_s22   ;;  %s1241_s21 = sphi %s1315_s21, %s1672_s21   ;;  %s1237_s20 = sphi %s1313_s20, %s1671_s20   ;;  %s1233_s19 = sphi %s1311_s19, %s1670_s19   ;;  %s1229_s18 = sphi %s1309_s18, %s1669_s18  }
  0x12   : > { %1644 = sst [smem:[#allocation19_spill]] %s1261_s26  ;;  %s807_s30 = sadd.s32 4294967294, %s1269_s28  }
  0x13   : > { %p56_p0 = scmp.ne.s32.totalorder %s1245_s22, %s1241_s21  ;;  %p1365_p1 = scmp.eq.s32.totalorder %s806_s29, 0 }
  0x14   : > { %p165_p2 = scmp.ne.s32.totalorder %s1237_s20, %s1233_s19  ;;  %p166_p3 = scmp.eq.s32.totalorder %s806_s29, 3 }
  0x15   : > { %p1373_p4 = por %p1365_p1, %p56_p0  ;;  %p171_p5 = scmp.ne.s32.totalorder %s1233_s19, %s1229_s18 }
  0x16   : > { %p1379_p6 = por %p166_p3, %p165_p2  ;;  %p172_p7 = scmp.eq.s32.totalorder %s807_s30, 3 }
  0x17   : > { %p808_p8 = scmp.ge.s32.totalorder %s1269_s28, 1  ;;  %p179_p9 = scmp.lt.s32.totalorder %s1269_s28, 5 }
  0x18   : > { %s1647_s8 = scalar_select %p1379_p6, 1, 0 }
  0x19   : > { %p1385_p10 = por %p172_p7, %p171_p5  ;;  %p1389_p11 = pnand %p808_p8, %p179_p9 }
  0x1a   : > { %1648 = sst [smem:[#allocation20_spill]] %s1647_s8  ;;  %s1271_s14 = smov [#allocation9]  }
  0x1b   : > { %s1649_s9 = scalar_select %p1385_p10, 1, 0 }
  0x1c   : > { %s1652_s3 = sld [smem:[#allocation26_spill]]  ;;  %p888_p12 = pneg %p1389_p11 }
  0x1d   : > { %1650 = sst [smem:[#allocation21_spill]] %s1649_s9  ;;  %s212_s15 = sshll.u32 %s1271_s14, 4  ;;  %s213_s15 = int_to_ptr.vmem [resolvable:$true] %s212_s15 }
  0x1e   : > { %p1400_p13 = pnand %p888_p12, %p1365_p1  ;;  %s1631_s17 = smov 128  }
  0x1f   : > { %s1632_s21 = smov 8   ;;  %s1654_s1 = sld [smem:[#allocation24_spill]] }
  0x20   : > { %s1655_s2 = sld [smem:[#allocation25_spill]]  ;;  %s1274_s9 = smov [#allocation7]  }
  0x21   : > { %s1656_s4 = sld [smem:[#allocation27_spill]]  ;;  %s1276_s12 = smov [#allocation11]  }
  0x22   : > { %s210_s13 = sshll.u32 %s1652_s3, 4  ;;  %s226_s14 = sshll.u32 %s1276_s12, 4  ;;  %s211_s13 = int_to_ptr.hbm [resolvable:$true] %s210_s13  ;;  %s227_s14 = int_to_ptr.vmem [resolvable:$true] %s226_s14 }
  0x23   : > { %897 = dma.hbm_to_vmem [thread:$0]  (!%p1400_p13), %s211_s13, 256, %s213_s15, [#allocation10], %s1631_s17, %s1631_s17, %s1632_s21  }
  0x24   : > { %s1275_s13 = smov [#allocation8]   ;;  %p50_p2 = scmp.ne.s32.totalorder %s1249_s23, %s1245_s22 }
  0x25   : > { %s191_s11 = sshll.u32 %s1654_s1, 4  ;;  %p51_p3 = scmp.eq.s32.totalorder %s1269_s28, 0  ;;  %s192_s11 = int_to_ptr.hbm [resolvable:$true] %s191_s11 }
  0x26   : > { %s201_s3 = sshll.u32 %s1655_s2, 4  ;;  %s155_s15 = sadd.s32 1, %s1237_s20  ;;  %s202_s3 = int_to_ptr.vmem [resolvable:$true] %s201_s3 }
  0x27   : > { %891 = dma.hbm_to_smem (!%p1400_p13), %s192_s11, 32, %s1274_s9, [#allocation5]  }
  0x28   : > { %894 = dma.vmem_to_smem (!%p1400_p13), %s202_s3, 16, %s1275_s13, [#allocation6]  }
  0x29   : > { %s224_s30 = sshll.u32 %s1656_s4, 4  ;;  %s33_s9 = sadd.s32 1, %s1261_s26  ;;  %s225_s30 = int_to_ptr.hbm [resolvable:$true] %s224_s30 }
  0x2a   : > { %900 = dma.hbm_to_vmem [thread:$0]  (!%p1400_p13), %s225_s30, 256, %s227_s14, [#allocation10], %s1631_s17, %s1631_s17, %s1632_s21  }
  0x2b   : > { %p34_p0 = scmp.ge.s32.totalorder %s33_s9, 2  ;;  %s36_s3 = sadd.s32 1, %s1265_s27 }
  0x2c   : > { %s43_s11 = sadd.s32 1, %s1249_s23  ;;  %p1438_p7 = por %p51_p3, %p50_p2 }
  0x2d   : > { %s1679_s9 = smov (%p34_p0, %s33_s9), 0  ;;  %s1681_s3 = smov (!%p34_p0, %s36_s3), %s1265_s27 }
  0x2e   : > { %1657 = sst [smem:[#allocation22_spill]] %s1679_s9  ;;  %p38_p5 = scmp.ge.s32.totalorder %s1681_s3, 2 }
  0x2f   : > { %s151_s16 = ssub.s32 %s1261_s26, %s1679_s9  ;;  %p913_p8 = scmp.lt.s32.totalorder %s1269_s28, 4 }
  0x30   : > { %s1683_s3 = smov (%p38_p5, %s1681_s3), 0  ;;  %s240_s29 = sand.u32 1, %s1249_s23  }
  0x31   : > { %1659 = sst [smem:[#allocation23_spill]] %s1683_s3  ;;  %s40_s30 = ssub.s32 %s1265_s27, %s1683_s3 }
  0x32   : > { %s867_s12 = sshll.u32 %s1265_s27, 7  ;;  %p41_p9 = scmp.eq.s32.totalorder %s40_s30, 0 }
  0x33   : > { %s152_s14 = sor.u32 %s151_s16, %s40_s30  ;;  %s814_s17 = sshll.u32 %s240_s29, 7 }
  0x34   : > { %p153_p12 = scmp.eq.s32.totalorder %s152_s14, 0  ;;  %s249_s9 = scalar_lea.hbm %s1624_s0, %s867_s12 }
  0x35   : > { %s1451_s21 = scalar_select %p41_p9, %s1249_s23, %s43_s11  }
  0x36   : > { %s1454_s1 = scalar_select %p153_p12, %s1237_s20, %s155_s15  }
  0x37   : > { %s250_s26 = sshll.u32 %s249_s9, 4  ;;  %s244_s18 = scalar_lea.vmem [#allocation2], %s814_s17  ;;  %s251_s26 = int_to_ptr.hbm [resolvable:$true] %s250_s26 }
  0x38   : > { %s252_s8 = sshll.u32 %s244_s18, 4  ;;  %p902_p13 = pnand %p913_p8, %p1438_p7  ;;  %s253_s8 = int_to_ptr.vmem [resolvable:$true] %s252_s8 }
  0x39   : > { %s241_s3 = scalar_lea.sflag [#allocation3], %s240_s29  ;;  %s1660_s16 = smov 8  }
  0x3a   : > { %s1661_s30 = smov 128   ;;  %264 = sbr.rel (%p1389_p11) target bundleno = 376 (0x178), region = 40 }
  0x3b   : > { %904 = dma.hbm_to_vmem [thread:$0]  (!%p902_p13), %s251_s26, 2048, %s253_s8, %s241_s3, %s1661_s30, %s1661_s30, %s1660_s16  }
  0x3c   : > { %s266_s2 = sand.u32 (!%p1389_p11), 1, %s1245_s22  }
  0x3d   : > { %s818_s4 = sshll.u32 (!%p1389_p11), %s266_s2, 7  ;;  %s267_s9 = scalar_lea.sflag (!%p1389_p11), [#allocation3], %s266_s2 }
  0x3e   : > { %s1469_s17 = scalar_lea.vmem (!%p1389_p11), [#allocation2], %s818_s4 }
  0x3f   : > { %1208 = dma.done.wait (%p1373_p4), %s267_s9, 2048  }
  0x40   : > { %1210 = vsyncadd (%p1373_p4), %s267_s9, 4294965248 }
  0x41   : > { %1212 = dma.done.wait (%p1365_p1), [#allocation5], 32  }
  0x42   : > { %1214 = vsyncadd (%p1365_p1), [#allocation5], 4294967264 }
  0x43   : > { %1216 = dma.done.wait (%p1365_p1), [#allocation6], 16  }
  0x44   : > { %1218 = vsyncadd (%p1365_p1), [#allocation6], 4294967280 }
  0x45   : > { %1220 = dma.done.wait (%p1365_p1), [#allocation10], 512  }
  0x46   : > { %1222 = vsyncadd (%p1365_p1), [#allocation10], 4294966784 }
  0x47   : > { %296 = sfence }
  0x48   : > { %s824_s18 = sshll.u32 %s1253_s24, 7  ;;  %v321_v0 = vld [vmem:[%s1469_s17 + $0x10] sm:$0xff]  ;;  %v322_v1 = vld [vmem:[%s1469_s17 + $0x18] sm:$0xff]  ;;  %v319_v2 = vld [vmem:[%s1469_s17] sm:$0xff]  ;;  %s1493_s13 = sld [smem:[#allocation8 + %s1253_s24]]  ;;  %vm386_vm0 = vcmask 64512  }
  0x49   : > { %s324_s26 = sld [smem:[#allocation7 + %s824_s18]]  ;;  %s335_s7 = sadd.s32 1, %s824_s18  ;;  %v827_v3 = vld [vmem:[%s1469_s17 + $0x30] sm:$0xff]  ;;  %v828_v4 = vld [vmem:[%s1469_s17 + $0x38] sm:$0xff]  ;;  %v825_v5 = vld [vmem:[%s1469_s17 + $0x20] sm:$0xff]  ;;  %vm641_vm1 = vcmask 130048  }
  0x4a   : > { %s336_s8 = sld [smem:[#allocation7 + %s335_s7]]  ;;  %s351_s10 = sadd.s32 2, %s824_s18  ;;  %v831_v7 = vld [vmem:[%s1469_s17 + $0x50] sm:$0xff]  ;;  %v832_v8 = vld [vmem:[%s1469_s17 + $0x58] sm:$0xff]  ;;  %v829_v9 = vld [vmem:[%s1469_s17 + $0x40] sm:$0xff] }
  0x4b   : > { %s352_s3 = sld [smem:[#allocation7 + %s351_s10]]  ;;  %s367_s6 = sadd.s32 3, %s824_s18  ;;  %v835_v12 = vld [vmem:[%s1469_s17 + $0x70] sm:$0xff]  ;;  %v836_v14 = vld [vmem:[%s1469_s17 + $0x78] sm:$0xff]  ;;  %v833_v20 = vld [vmem:[%s1469_s17 + $0x60] sm:$0xff] }
  0x4c   : > { %s368_s11 = sld [smem:[#allocation7 + %s367_s6]]  ;;  %v320_v21 = vld [vmem:[%s1469_s17 + $0x8] sm:$0xff]  ;;  %v384_v50 = vld [vmem:[#allocation9] sm:$0xff]  ;;  %v486_v53 = vld [vmem:[#allocation11 + $0x8] sm:$0xff]  ;;  %s316_s15 = sand.u32 1, %s1233_s19  }
  0x4d   : > { %v826_v22 = vld [vmem:[%s1469_s17 + $0x28] sm:$0xff]  ;;  %v485_v55 = vld [vmem:[#allocation11] sm:$0xff]  ;;  %s823_s29 = sshll.u32 %s316_s15, 7  ;;  %s862_s14 = sshll.u32 %s1253_s24, 4 }
  0x4e   : > { %v830_v27 = vld [vmem:[%s1469_s17 + $0x48] sm:$0xff]  ;;  %v379_v40 = vstv %s1493_s13  ;;  %s1535_s12 = scalar_lea.vmem [#allocation12], %s823_s29  ;;  %s863_s16 = sshll.u32 %s1257_s25, 5 }
  0x4f   : > { %v325_v6 = vstv %s324_s26  ;;  %v834_v32 = vld [vmem:[%s1469_s17 + $0x68] sm:$0xff]  ;;  %s670_s30 = sadd.s32 %s863_s16, %s862_s14  ;;  %s673_s9 = sshll.u32 %s1535_s12, 4  ;;  %s674_s9 = int_to_ptr.vmem [resolvable:$true] %s673_s9 }
  0x50   : > { %v328_v10 = vmul.f32 %v325_v6, %v321_v0  ;;  %v337_v11 = vstv %s336_s8  ;;  %v329_v13 = vmul.f32 %v325_v6, %v322_v1  ;;  %v326_v15 = vmul.f32 %v325_v6, %v319_v2  ;;  %v385_v56 = vld [vmem:[#allocation9 + $0x8] sm:$0xff]  ;;  %s864_s24 = sshll.u32 %s670_s30, 3  ;;  %s659_s26 = scalar_lea.sflag [#allocation4], %s316_s15 }
  0x51   : > { %v340_v16 = vmul.f32 %v827_v3, %v337_v11  ;;  %v353_v17 = vstv %s352_s3  ;;  %v341_v18 = vmul.f32 %v828_v4, %v337_v11  ;;  %v338_v19 = vmul.f32 %v825_v5, %v337_v11  ;;  %s672_s4 = scalar_lea.hbm %s1629_s5, %s864_s24  ;;  %s1155_s6 = scalar_lea.hbm %s1629_s5, 512 }
  0x52   : > { %v356_v23 = vmul.f32 %v831_v7, %v353_v17  ;;  %v369_v24 = vstv %s368_s11  ;;  %v357_v25 = vmul.f32 %v832_v8, %v353_v17  ;;  %v354_v26 = vmul.f32 %v829_v9, %v353_v17  ;;  %s675_s18 = sshll.u32 %s672_s4, 4  ;;  %s676_s18 = int_to_ptr.hbm [resolvable:$true] %s675_s18 }
  0x53   : > { %v344_v28 = vadd.f32 %v340_v16, %v328_v10  ;;  %v372_v29 = vmul.f32 %v835_v12, %v369_v24  ;;  %v345_v30 = vadd.f32 %v341_v18, %v329_v13  ;;  %v373_v31 = vmul.f32 %v836_v14, %v369_v24  ;;  %s1149_s7 = sshra.s32 %s676_s18, 4  ;;  %s1150_s7 = int_to_ptr.hbm [resolvable:$true] %s1149_s7 }
  0x54   : > { %v342_v33 = vadd.f32 %v338_v19, %v326_v15  ;;  %v370_v34 = vmul.f32 %v833_v20, %v369_v24  ;;  %v327_v35 = vmul.f32 %v325_v6, %v320_v21  ;;  %v339_v36 = vmul.f32 %v826_v22, %v337_v11  ;;  %s1151_s8 = scalar_lea.hbm %s1150_s7, 128  ;;  %p1156_p0 = scmp.lt.s32.totalorder %s1150_s7, %s1629_s5 }
  0x55   : > { %v360_v37 = vadd.f32 %v356_v23, %v344_v28  ;;  %v361_v38 = vadd.f32 %v357_v25, %v345_v30  ;;  %v355_v39 = vmul.f32 %v830_v27, %v353_v17  ;;  %v371_v43 = vmul.f32 %v834_v32, %v369_v24  ;;  %p1152_p1 = scmp.ne.s32.totalorder %s1150_s7, %s1151_s8  ;;  %p1157_p2 = scmp.lt.s32.totalorder %s1155_s6, %s1151_s8 }
  0x56   : > { %v358_v41 = vadd.f32 %v354_v26, %v342_v33  ;;  %v343_v42 = vadd.f32 %v339_v36, %v327_v35 }
  0x57   : > { %v376_v44 = vadd.f32 %v372_v29, %v360_v37  ;;  %v377_v45 = vadd.f32 %v373_v31, %v361_v38  ;;  %p1153_p4 = pnand %p1152_p1, %p1379_p6  ;;  %p1158_p3 = por %p1157_p2, %p1156_p0 }
  0x58   : > { %v374_v46 = vadd.f32 %v370_v34, %v358_v41  ;;  %v359_v47 = vadd.f32 %v355_v39, %v343_v42 }
  0x59   : > { %v382_v48 = vadd.f32 %v379_v40, %v376_v44  ;;  %v383_v49 = vadd.f32 %v379_v40, %v377_v45  ;;  %p1154_p11 = pneg %p1153_p4 }
  0x5a   : > { %v380_v51 = vadd.f32 %v379_v40, %v374_v46  ;;  %v375_v52 = vadd.f32 %v371_v43, %v359_v47 }
  0x5b   : > { %454 = vmatpush.msra.mxu2 %v382_v48  ;;  %477 = vmatpush.msra.mxu3 %v383_v49  ;;  %p1159_p5 = pnand %p1158_p3, %p1154_p11 }
  0x5c   : > { %841 = vmatmul.msk.f32.vlgmr.msra.gmra.mxu2 %vm386_vm0, %v384_v50  ;;  %843 = vmatmul.msk.f32.vlgmr.msra.gmra.mxu3 %vm386_vm0, %v384_v50  ;;  %v381_v54 = vadd.f32 %v379_v40, %v375_v52 }
  0x5d   : > { %408 = vmatpush.msra.mxu0 %v380_v51  ;;  %853 = vmatpush.xpose.msk.msrb.mxu2 %vm386_vm0, %v486_v53 }
  0x5e   : > { %431 = vmatpush.msra.mxu1 %v381_v54  ;;  %837 = vmatmul.msk.f32.vlgmr.msra.gmra.mxu0 %vm386_vm0, %v384_v50 }
  0x5f   : > { %839 = vmatmul.msk.f32.vlgmr.msra.gmra.mxu1 %vm386_vm0, %v384_v50  ;;  %857 = vmatpush.xpose.msk.msrb.mxu3 %vm386_vm0, %v486_v53 }
  0x60   : > { %845 = vmatpush.xpose.msk.msrb.mxu0 %vm386_vm0, %v486_v53  ;;  %849 = vmatpush.xpose.msk.msrb.mxu1 %vm386_vm0, %v486_v53 }
  0x61   : > { %854 = vmatpush.xpose.msk.msrb.mxu2 %vm386_vm0, %v485_v55 }
  0x63   : > { %858 = vmatpush.xpose.msk.msrb.mxu3 %vm386_vm0, %v485_v55 }
  0x64   : > { %842 = vmatmul.msk.f32.gmra.mxu2 %vm386_vm0, %v385_v56  ;;  %844 = vmatmul.msk.f32.gmra.mxu3 %vm386_vm0, %v385_v56 }
  0x65   : > { %846 = vmatpush.xpose.msk.msrb.mxu0 %vm386_vm0, %v485_v55  ;;  %850 = vmatpush.xpose.msk.msrb.mxu1 %vm386_vm0, %v485_v55 }
  0x66   : > { %838 = vmatmul.msk.f32.gmra.mxu0 %vm386_vm0, %v385_v56 }
  0x67   : > { %840 = vmatmul.msk.f32.gmra.mxu1 %vm386_vm0, %v385_v56 }
  0xdb   : > { %v410_v57 = vpop.f32.mrf.mxu0 }
  0xdc   : > { %v433_v58 = vpop.f32.mrf.mxu1  ;;  %847 = vmatmul.msk.f32.vlgmr.msrb.gmra.mxu0 %vm386_vm0, %v410_v57 }
  0xdd   : > { %851 = vmatmul.msk.f32.vlgmr.msrb.gmra.mxu1 %vm386_vm0, %v433_v58 }
  0xdf   : > { %v456_v59 = vpop.f32.mrf.mxu2  ;;  %v479_v60 = vpop.f32.mrf.mxu3 }
  0xe0   : > { %855 = vmatmul.msk.f32.vlgmr.msrb.gmra.mxu2 %vm386_vm0, %v456_v59  ;;  %859 = vmatmul.msk.f32.vlgmr.msrb.gmra.mxu3 %vm386_vm0, %v479_v60 }
  0xe3   : > { %v413_v61 = vpop.f32.mrf.mxu0 }
  0xe4   : > { %v436_v62 = vpop.f32.mrf.mxu1  ;;  %848 = vmatmul.msk.f32.gmra.mxu0 %vm386_vm0, %v413_v61 }
  0xe5   : > { %852 = vmatmul.msk.f32.gmra.mxu1 %vm386_vm0, %v436_v62 }
  0xe7   : > { %v459_v63 = vpop.f32.mrf.mxu2  ;;  %v482_v0 = vpop.f32.mrf.mxu3 }
  0xe8   : > { %856 = vmatmul.msk.f32.gmra.mxu2 %vm386_vm0, %v459_v63  ;;  %860 = vmatmul.msk.f32.gmra.mxu3 %vm386_vm0, %v482_v0 }
 0x159   : > { %v516_v1 = vpop.f32.mrf.mxu0 }
 0x15a   : > { %v609_v2 = vmul.f32 0.25, %v516_v1  ;;  %v615_v3 = vmul.f32 0.75, %v516_v1  ;;  %v545_v4 = vpop.f32.mrf.mxu1 }
 0x15b   : > { %v611_v5 = vmul.f32 0.25, %v545_v4  ;;  %v617_v6 = vmul.f32 0.75, %v545_v4 }
 0x15c   : > { %v623_v7 = vadd.f32 %v615_v3, %v609_v2 }
 0x15d   : > { %v625_v8 = vadd.f32 %v617_v6, %v609_v2  ;;  %v633_v9 = vadd.f32 %v615_v3, %v611_v5 }
 0x15e   : > { %642 = vst.msk [vmem:[%s1535_s12] sm:$0xff] %vm641_vm1, %v623_v7 }
 0x15f   : > { %644 = vst.msk [vmem:[%s1535_s12 + $0x10] sm:$0xff] %vm641_vm1, %v633_v9 }
 0x160   : > { %646 = vst.msk [vmem:[%s1535_s12 + $0x20] sm:$0xff] %vm641_vm1, %v625_v8 }
 0x161   : > { %v519_v10 = vpop.f32.mrf.mxu0 }
 0x162   : > { %v610_v11 = vmul.f32 0.25, %v519_v10  ;;  %v616_v12 = vmul.f32 0.75, %v519_v10  ;;  %v548_v13 = vpop.f32.mrf.mxu1 }
 0x163   : > { %v574_v14 = vpop.f32.mrf.mxu2  ;;  %v603_v15 = vpop.f32.mrf.mxu3  ;;  %v612_v21 = vmul.f32 0.25, %v548_v13  ;;  %v618_v25 = vmul.f32 0.75, %v548_v13 }
 0x164   : > { %v613_v16 = vmul.f32 0.25, %v574_v14  ;;  %v619_v17 = vmul.f32 0.75, %v574_v14  ;;  %v621_v18 = vmul.f32 0.75, %v603_v15  ;;  %v631_v19 = vmul.f32 0.25, %v603_v15 }
 0x165   : > { %v624_v20 = vadd.f32 %v616_v12, %v610_v11  ;;  %v634_v28 = vadd.f32 %v616_v12, %v612_v21  ;;  %v626_v29 = vadd.f32 %v618_v25, %v610_v11 }
 0x166   : > { %v627_v22 = vadd.f32 %v619_v17, %v611_v5  ;;  %v635_v23 = vadd.f32 %v617_v6, %v613_v16  ;;  %v637_v24 = vadd.f32 %v631_v19, %v619_v17  ;;  %v629_v26 = vadd.f32 %v621_v18, %v613_v16 }
 0x167   : > { %643 = vst.msk [vmem:[%s1535_s12 + $0x8] sm:$0xff] %vm641_vm1, %v624_v20  ;;  %v639_v27 = vadd.f32 %v631_v19, %v621_v18 }
 0x168   : > { %648 = vst.msk [vmem:[%s1535_s12 + $0x30] sm:$0xff] %vm641_vm1, %v635_v23 }
 0x169   : > { %650 = vst.msk [vmem:[%s1535_s12 + $0x40] sm:$0xff] %vm641_vm1, %v627_v22 }
 0x16a   : > { %652 = vst.msk [vmem:[%s1535_s12 + $0x50] sm:$0xff] %vm641_vm1, %v637_v24 }
 0x16b   : > { %654 = vst.msk [vmem:[%s1535_s12 + $0x60] sm:$0xff] %vm641_vm1, %v629_v26  ;;  %v577_v30 = vpop.f32.mrf.mxu2  ;;  %v606_v31 = vpop.f32.mrf.mxu3 }
 0x16c   : > { %656 = vst.msk [vmem:[%s1535_s12 + $0x70] sm:$0xff] %vm641_vm1, %v639_v27  ;;  %v614_v32 = vmul.f32 0.25, %v577_v30  ;;  %v620_v33 = vmul.f32 0.75, %v577_v30  ;;  %v622_v34 = vmul.f32 0.75, %v606_v31  ;;  %v632_v35 = vmul.f32 0.25, %v606_v31 }
 0x16d   : > { %645 = vst.msk [vmem:[%s1535_s12 + $0x18] sm:$0xff] %vm641_vm1, %v634_v28 }
 0x16e   : > { %647 = vst.msk [vmem:[%s1535_s12 + $0x28] sm:$0xff] %vm641_vm1, %v626_v29  ;;  %v628_v36 = vadd.f32 %v620_v33, %v612_v21  ;;  %v636_v37 = vadd.f32 %v618_v25, %v614_v32  ;;  %v638_v38 = vadd.f32 %v632_v35, %v620_v33  ;;  %v630_v39 = vadd.f32 %v622_v34, %v614_v32 }
 0x16f   : > { %v640_v40 = vadd.f32 %v632_v35, %v622_v34 }
 0x170   : > { %649 = vst.msk [vmem:[%s1535_s12 + $0x38] sm:$0xff] %vm641_vm1, %v636_v37 }
 0x171   : > { %651 = vst.msk [vmem:[%s1535_s12 + $0x48] sm:$0xff] %vm641_vm1, %v628_v36 }
 0x172   : > { %653 = vst.msk [vmem:[%s1535_s12 + $0x58] sm:$0xff] %vm641_vm1, %v638_v38 }
 0x173   : > { %655 = vst.msk [vmem:[%s1535_s12 + $0x68] sm:$0xff] %vm641_vm1, %v630_v39 }
 0x174   : > { %657 = vst.msk [vmem:[%s1535_s12 + $0x78] sm:$0xff] %vm641_vm1, %v640_v40 }
 0x175   : > { %1162 = shalt.err (!%p1159_p5)
}
 0x176   : > { %s1277_s15 = smov 128   ;;  %s1278_s29 = smov 8  }
 0x177   : > { %886 = dma.vmem_to_hbm [thread:$0]  (%p1379_p6), %s674_s9, 2048, %s676_s18, %s659_s26, %s1277_s15, %s1277_s15, %s1278_s29  }
 0x178 PF: > { %s1663_s12 = sld [smem:[#allocation18_spill]]  ;;  %p918_p7 = scmp.ge.s32.totalorder %s1269_s28, 2 }
 0x17a   : > { %p906_p8 = pnand %p918_p7, %p1385_p10 }
 0x17c   : > { %p907_p9 = pneg %p906_p8 }
 0x17e   : > { %s690_s16 = sand.u32 1, %s1663_s12  }
 0x17f   : > { %s691_s30 = scalar_lea.sflag [#allocation4], %s690_s16 }
 0x180   : > { %1224 = dma.done.wait (%p907_p9), %s691_s30, 2048  }
 0x181   : > { %1226 = vsyncadd (%p907_p9), %s691_s30, 4294965248  ;;  %s24_s28 = sadd.s32 1, %s1269_s28   ;;  %s1665_s24 = smov %s1451_s21 }
 0x182   : > { %p21_p12 = scmp.ge.s32.totalorder %s24_s28, 6   ;;  %s1666_s25 = sld [smem:[#allocation19_spill]] }
 0x183   : > { %s1667_s26 = sld [smem:[#allocation22_spill]]  ;;  %s1669_s18 = smov %s1233_s19 }
 0x184   : > { %s1668_s2 = sld [smem:[#allocation23_spill]]  ;;  %s1670_s19 = smov %s1237_s20 }
 0x185   : > { %s1671_s20 = smov %s1454_s1  ;;  %s1672_s21 = smov %s1245_s22 }
 0x186   : > { %s1673_s22 = smov %s1249_s23  ;;  %s1674_s23 = smov %s1665_s24 }
 0x187   :  { %23 = sbr.rel (!%p21_p12) target bundleno = 17 (0x11), region = 106 }
 0x188   : > { %s1675_s24 = smov %s1666_s25  ;;  %s1676_s25 = smov %s1265_s27 }
 0x18a   : > { %s1677_s27 = smov %s1668_s2 }
 0x18c   :  { %697 = vsyncpa [#allocation3], 1 }
 0x18d   :  { %699 = vsyncpa [#allocation3 + $0x1], 1 }
 0x18e   :  { %700 = vsyncpa [#allocation10], 1 }
 0x18f   :  { %701 = vsyncpa [#allocation4], 1 }
 0x190   :  { %703 = vsyncpa [#allocation4 + $0x1], 1 }
 0x191   :  { %704 = vsyncpa [#allocation5], 1 }
 0x192   :  { %706 = vsyncpa [#allocation5 + $0x1], 1 }
 0x193   :  { %707 = vsyncpa [#allocation6], 1 }
 0x194   :  { %709 = vsyncpa [#allocation6 + $0x1], 1 }

</bundles_post_ra>
